<compile_context>
chip_gen: v7x
topology: tpu7x:2x2x1
jax: 0.10.0
libtpu: 0.0.40
codegen_flags: <defaults>
</compile_context>

<pallas_src>
import functools

import jax
import jax.numpy as jnp
from jax.experimental import pallas as pl
from jax.experimental.pallas import tpu as pltpu


def _round_up(v, m):
    return ((v + m - 1) // m) * m


def _vmem_capacity_bytes():
    """Per-TensorCore VMEM capacity; conservative fallback if the query fails."""
    try:
        cap = getattr(pltpu.get_tpu_info(), "vmem_capacity_bytes", None)
        if cap:
            return int(cap)
    except Exception:
        pass
    return 64 * 1024 * 1024  # v7x-sized fallback (smallest of v5e/v6e/v7x)


def _choose_tiles(B, C, L, itemsize, budget):
    """Pick (tb, tc, tl). Prefers a full-C block (no accumulator / masking /
    reduction grid axis); falls back to a split-C plan that fits `budget`."""
    sub = max(8, 32 // itemsize)          # sublane packing of the dtype
    tb = min(B, 8)

    def block_bytes(tc, tl):
        tl_pad = _round_up(tl, 128)
        in_b = 2 * tb * _round_up(tc, sub) * tl_pad * itemsize    # dbl-buffered input
        out_b = 2 * _round_up(tb, sub) * tl_pad * itemsize        # dbl-buffered output
        acc_b = 0 if tc >= C else _round_up(tb, 8) * tl_pad * 4   # f32 accumulator
        return in_b + out_b + acc_b

    # Lane-tile candidates, largest first; full L is always a legal block and
    # avoids a ragged edge tile, so include it when it is not huge.
    lane_cands = [t for t in (4096, 2048, 1024, 512, 256, 128) if t <= L]
    if L <= 4096 and L not in lane_cands:
        lane_cands.insert(0, L)

    # Pass 1: full-C blocks, lane tiles down to 512 (or full L when smaller).
    big_lanes = [t for t in lane_cands if t >= min(512, L)]
    fits = [t for t in big_lanes if block_bytes(C, t) <= budget]
    if fits:
        exact = [t for t in fits if L % t == 0]   # prefer a tl that divides L
        return tb, C, (exact[0] if exact else fits[0])

    # Pass 2: split C with an accumulator; prefer channel tiles dividing C.
    ch_cands = [c for c in (4096, 2048, 1024, 512, 256, 128, 64, 32, 16, 8)
                if c < C and c % sub == 0]
    ch_cands.sort(key=lambda c: (C % c != 0, -c))
    for tl in lane_cands:
        for tc in ch_cands:
            if block_bytes(tc, tl) <= budget:
                return tb, tc, tl

    # Last resort: smallest sensible tiles.
    return tb, min(C, sub), min(L, 128)


def _mean_fullc_kernel(x_ref, o_ref, *, inv_c):
    # x_ref: (tb, C, tl); o_ref: (tb, tl). Single pass, no accumulator, no mask.
    s = jnp.sum(x_ref[...], axis=1, dtype=jnp.float32)   # widen fused into the add
    o_ref[...] = (s * inv_c).astype(o_ref.dtype)


def _mean_splitc_kernel(x_ref, o_ref, acc_ref, *, num_channels, chan_tile):
    # x_ref: (tb, tc, tl); o_ref: (tb, tl); acc_ref: (tb, tl) f32 scratch,
    # resident across the innermost ("arbitrary") C grid axis.
    c = pl.program_id(2)
    last = pl.num_programs(2) - 1

    @pl.when(c == 0)
    def _():
        acc_ref[...] = jnp.zeros_like(acc_ref)

    if num_channels % chan_tile != 0:
        # Mask padded channels ONLY on the ragged last tile; steady-state steps
        # remain a pure widen+add stream (keeps the kernel HBM-bound on v7x).
        @pl.when(c != last)
        def _():
            acc_ref[...] += jnp.sum(x_ref[...], axis=1, dtype=jnp.float32)

        @pl.when(c == last)
        def _():
            x = x_ref[...]
            ch = c * chan_tile + jax.lax.broadcasted_iota(jnp.int32, x.shape, 1)
            x = jnp.where(ch < num_channels, x, jnp.zeros_like(x))
            acc_ref[...] += jnp.sum(x, axis=1, dtype=jnp.float32)
    else:
        acc_ref[...] += jnp.sum(x_ref[...], axis=1, dtype=jnp.float32)

    @pl.when(c == last)
    def _():
        o_ref[...] = (acc_ref[...] * (1.0 / num_channels)).astype(o_ref.dtype)


def mean_axis1(x: jax.Array, *, tile_b=None, tile_c=None, tile_l=None,
               force_pallas=False) -> jax.Array:
    """Mean over axis=1 of a (B, C, L) array, computed with a Pallas TPU kernel."""
    if x.ndim != 3:
        raise ValueError(f"expected a (B, C, L) array, got shape {x.shape}")
    if not jnp.issubdtype(x.dtype, jnp.floating):
        # torch.mean rejects integer inputs as well.
        raise ValueError("mean_axis1 only supports floating-point inputs")

    B, C, L = x.shape
    itemsize = jnp.dtype(x.dtype).itemsize

    # Tiny inputs: pallas_call dispatch + per-step overhead dominates; XLA's
    # fused reduction is strictly faster below ~1 MiB on every TPU generation.
    if not force_pallas and B * C * L * itemsize < (1 << 20):
        return jnp.mean(x, axis=1)

    vmem_cap = _vmem_capacity_bytes()
    vmem_limit = (vmem_cap * 3) // 4          # scoped-VMEM limit handed to Mosaic
    budget = vmem_limit // 2                  # what blocks may spend (headroom left)

    tb, tc, tl = _choose_tiles(B, C, L, itemsize, budget)

    # Validated overrides (rounded to legal block shapes).
    sub = max(8, 32 // itemsize)
    if tile_b is not None:
        tb = int(tile_b)
        tb = B if (tb >= B or B <= 8) else min(B, _round_up(max(tb, 1), 8))
    if tile_c is not None:
        tc = int(tile_c)
        tc = C if tc >= C else min(C, _round_up(max(tc, 1), sub))
    if tile_l is not None:
        tl = int(tile_l)
        tl = L if tl >= L else min(L, max(128, (tl // 128) * 128))

    gb = pl.cdiv(B, tb)
    gl = pl.cdiv(L, tl)
    gc = pl.cdiv(C, tc)

    if gc == 1:
        # Full-C blocks: 2-D grid, no accumulator, no masking, no pl.when.
        kernel = functools.partial(_mean_fullc_kernel, inv_c=1.0 / C)
        scratch_shapes = []
        dims = ("parallel", "parallel")
        if gl >= gb:                          # put the bigger parallel axis first
            grid = (gl, gb)
            in_specs = [pl.BlockSpec((tb, C, tl), lambda l, b: (b, 0, l))]
            out_specs = pl.BlockSpec((tb, tl), lambda l, b: (b, l))
        else:
            grid = (gb, gl)
            in_specs = [pl.BlockSpec((tb, C, tl), lambda b, l: (b, 0, l))]
            out_specs = pl.BlockSpec((tb, tl), lambda b, l: (b, l))
    else:
        # Split-C: innermost "arbitrary" reduction axis with an f32 accumulator.
        kernel = functools.partial(_mean_splitc_kernel, num_channels=C, chan_tile=tc)
        scratch_shapes = [pltpu.VMEM((tb, tl), jnp.float32)]
        dims = ("parallel", "parallel", "arbitrary")
        if gl >= gb:
            grid = (gl, gb, gc)
            in_specs = [pl.BlockSpec((tb, tc, tl), lambda l, b, c: (b, c, l))]
            out_specs = pl.BlockSpec((tb, tl), lambda l, b, c: (b, l))
        else:
            grid = (gb, gl, gc)
            in_specs = [pl.BlockSpec((tb, tc, tl), lambda b, l, c: (b, c, l))]
            out_specs = pl.BlockSpec((tb, tl), lambda b, l, c: (b, l))

    return pl.pallas_call(
        kernel,
        out_shape=jax.ShapeDtypeStruct((B, L), x.dtype),
        grid_spec=pltpu.PrefetchScalarGridSpec(
            num_scalar_prefetch=0,
            grid=grid,
            in_specs=in_specs,
            out_specs=out_specs,
            scratch_shapes=scratch_shapes,
        ),
        compiler_params=pltpu.CompilerParams(
            dimension_semantics=dims,
            vmem_limit_bytes=int(vmem_limit),
        ),
    )(x)


if __name__ == "__main__":
    key = jax.random.PRNGKey(0)
    k1, k2, k3 = jax.random.split(key, 3)

    # (batch, channels, length) activation, consistent with the 1-D VAE module.
    x1 = jax.random.normal(k1, (2, 4, 256), dtype=jnp.float32)
    out1 = jax.block_until_ready(mean_axis1(x1, force_pallas=True))
    ref1 = jnp.mean(x1, axis=1)
    assert out1.shape == ref1.shape == (2, 256)
    assert jnp.allclose(out1, ref1, atol=1e-5, rtol=1e-5)

    # Split-C accumulator path with ragged edges on every axis
    # (B % tb, C % tc, L % tl all nonzero) -> exercises the gated channel mask.
    x2 = jax.random.normal(k2, (10, 20, 300), dtype=jnp.float32)
    out2 = jax.block_until_ready(
        mean_axis1(x2, tile_b=8, tile_c=8, tile_l=128, force_pallas=True))
    ref2 = jnp.mean(x2, axis=1)
    assert out2.shape == ref2.shape == (10, 300)
    assert jnp.allclose(out2, ref2, atol=1e-5, rtol=1e-5)

    # bf16 input: widening is fused into the f32 reduction, full-C path.
    x3 = jax.random.normal(k3, (4, 16, 384), dtype=jnp.bfloat16)
    out3 = jax.block_until_ready(mean_axis1(x3, force_pallas=True))
    ref3 = jnp.mean(x3.astype(jnp.float32), axis=1).astype(jnp.bfloat16)
    assert out3.shape == ref3.shape == (4, 384)
    assert jnp.allclose(out3.astype(jnp.float32), ref3.astype(jnp.float32),
                        atol=1e-2, rtol=1e-2)

    print("KERNEL_OK")
</pallas_src>

<mosaic_0001>
module attributes {stable_mosaic.version = 11 : i64} {
  func.func @_mean_fullc_kernel(%arg0: i32, %arg1: i32, %arg2: memref<2x4x256xf32, #tpu.memory_space<vmem>>, %arg3: memref<2x256xf32, #tpu.memory_space<vmem>>) attributes {dimension_semantics = [#tpu.dimension_semantics<parallel>, #tpu.dimension_semantics<parallel>], iteration_bounds = array<i64: 1, 1>, scalar_prefetch = 0 : i64, scratch_operands = 0 : i64, tpu.core_type = #tpu.core_type<tc>, window_params = [{transform_indices = @transform_0, window_bounds = array<i64: 2, 4, 256>}, {transform_indices = @transform_1, window_bounds = array<i64: 2, 256>}]} {
    %c0 = arith.constant 0 : index
    %c0_0 = arith.constant 0 : index
    %c0_1 = arith.constant 0 : index
    %0 = vector.load %arg2[%c0, %c0_0, %c0_1] : memref<2x4x256xf32, #tpu.memory_space<vmem>>, vector<2x4x256xf32>
    %cst = arith.constant dense<0.000000e+00> : vector<2x256xf32>
    %1 = vector.multi_reduction <add>, %0, %cst [1] : vector<2x4x256xf32> to vector<2x256xf32>
    %cst_2 = arith.constant 2.500000e-01 : f32
    %2 = vector.broadcast %cst_2 : f32 to vector<2x256xf32>
    %3 = arith.mulf %1, %2 : vector<2x256xf32>
    %c0_3 = arith.constant 0 : index
    %c0_4 = arith.constant 0 : index
    %4 = vector.load %arg3[%c0_3, %c0_4] : memref<2x256xf32, #tpu.memory_space<vmem>>, vector<2x256xf32>
    tpu.vector_store %arg3[%c0_3, %c0_4], %3 {strides = array<i32>} : memref<2x256xf32, #tpu.memory_space<vmem>>, vector<2x256xf32>,
    return
  }
  func.func @transform_0(%arg0: i32, %arg1: i32) -> (i32, i32, i32) {
    %c0_i32 = arith.constant 0 : i32
    %c0_i32_0 = arith.constant 0 : i32
    return %arg1, %c0_i32, %arg0 : i32, i32, i32
  }
  func.func @transform_1(%arg0: i32, %arg1: i32) -> (i32, i32) {
    %c0_i32 = arith.constant 0 : i32
    return %arg1, %arg0 : i32, i32
  }
}

</mosaic_0001>

<bundles_post_ra>
// kernel: tpu_custom_call.1
= control target key start
LH: loop header
LB: loop body
LE: loop exit
PB: predicated region body
PF: predicated region fallthrough
CT: control target
= control target key end

     0   :  { %6 = vsyncpa [#allocation3], 0  ;;  %s208_s0 = inlined_call_operand.hbm [shape: f32[2,4,256], index: 0, kind: input, shape index: {}]   ;;  %s209_s1 = inlined_call_operand.hbm [shape: f32[2,256], index: 1, kind: output, shape index: {}]  }
   0x1   :  { %7 = vsyncpa [#allocation4], 0  ;;  %s169_s6 = smov [#allocation2]   ;;  %s121_s10 = scalar_lea.hbm %s208_s0, 256 }
   0x2   :  { %s13_s7 = sshll.u32 %s169_s6, 4  ;;  %p122_p0 = scmp.ne.s32.totalorder %s208_s0, %s121_s10  ;;  %s14_s7 = int_to_ptr.vmem [resolvable:$true] %s13_s7 }
   0x3   :  { %p125_p1 = scmp.lt.u32.totalorder %s121_s10, %s208_s0 }
   0x5   :  { %p127_p2 = pnand %p125_p1, %p122_p0 }
   0x7   :  { %130 = shalt.err (!%p127_p2)
}
   0x8   :  { %s131_s15 = scalar_lea.vmem %s14_s7, 256  ;;  %p136_p4 = scmp.lt.s32.totalorder %s14_s7, %s14_s7 }
   0x9   :  { %p132_p3 = scmp.ne.s32.totalorder %s14_s7, %s131_s15  ;;  %p137_p5 = scmp.lt.s32.totalorder %s131_s15, %s131_s15 }
   0xb   :  { %p138_p6 = por %p137_p5, %p136_p4 }
   0xd   :  { %p139_p7 = pnand %p138_p6, %p132_p3 }
   0xf   :  { %142 = shalt.err (!%p139_p7)
}
  0x10   :  { %s170_s16 = smov 128   ;;  %s171_s17 = smov 8  }
  0x11   :  { %19 = dma.hbm_to_vmem [thread:$0]  %s208_s0, 256, %s14_s7, [#allocation3], %s170_s16, %s170_s16, %s171_s17  }
  0x12   :  { %165 = dma.done.wait [#allocation3], 256  }
  0x13   :  { %166 = vsyncadd [#allocation3], 4294967040  ;;  %vm31_vm0 = vcmask 1043456   ;;  %v23_v0 = vld [vmem:[#allocation2] sm:$0xff]  ;;  %v24_v1 = vld [vmem:[#allocation2 + $0x8] sm:$0xff]  ;;  %v72_v20 = vlaneseq  ;;  %vm89_vm1 = vcmask 1041409  }
  0x14   :  { %v27_v2 = vcombine.high %v23_v0, %v23_v0  ;;  %v28_v3 = vcombine.high %v24_v1, %v24_v1  ;;  %v32_v4 = vsel %vm31_vm0, %v23_v0, 0.0  ;;  %v46_v5 = vsel %vm31_vm0, %v24_v1, 0.0  ;;  %s173_s0 = smov [#allocation5]  }
  0x15   :  { %v33_v6 = vrot.slane %v32_v4, 4  ;;  %v47_v7 = vrot.slane %v46_v5, 4  ;;  %v172_v18 = vmov 1983009808   ;;  %v73_v30 = vshrl.u32 %v72_v20, 7  ;;  %s105_s20 = sshll.u32 %s173_s0, 4  ;;  %s106_s20 = int_to_ptr.vmem [resolvable:$true] %s105_s20 }
  0x16   :  { %v39_v8 = vsel %vm31_vm0, %v27_v2, 0.0  ;;  %v53_v9 = vsel %vm31_vm0, %v28_v3, 0.0  ;;  %v70_v19 = vunpack.c.l.s4 %v172_v18  ;;  %vm91_vm2 = vcmask 1043459   ;;  %s143_s21 = scalar_lea.vmem %s106_s20, 64  ;;  %p148_p9 = scmp.lt.s32.totalorder %s106_s20, %s106_s20 }
  0x17   :  { %v34_v10 = vadd.f32 %v33_v6, %v32_v4  ;;  %v40_v11 = vrot.slane %v39_v8, 4  ;;  %v48_v12 = vadd.f32 %v47_v7, %v46_v5  ;;  %v54_v13 = vrot.slane %v53_v9, 4  ;;  %p144_p8 = scmp.ne.s32.totalorder %s106_s20, %s143_s21  ;;  %p149_p10 = scmp.lt.s32.totalorder %s143_s21, %s143_s21 }
  0x18   :  { %v71_v29 = vunpack.c.0.s8 %v70_v19  ;;  %vm93_vm3 = vcmask 1045509   ;;  %vm95_vm4 = vcmask 1047559  }
  0x19   :  { %v35_v14 = vrot.slane %v34_v10, 2  ;;  %v41_v15 = vadd.f32 %v40_v11, %v39_v8  ;;  %v49_v16 = vrot.slane %v48_v12, 2  ;;  %v55_v17 = vadd.f32 %v54_v13, %v53_v9  ;;  %p150_p11 = por %p149_p10, %p148_p9 }
  0x1a   :  { %v74_v41 = vsub.s32 %v71_v29, %v73_v30 }
  0x1b   :  { %v36_v21 = vadd.f32 %v35_v14, %v34_v10  ;;  %v42_v22 = vrot.slane %v41_v15, 2  ;;  %v50_v23 = vadd.f32 %v49_v16, %v48_v12  ;;  %v56_v24 = vrot.slane %v55_v17, 2  ;;  %p151_p12 = pnand %p150_p11, %p144_p8 }
  0x1d   :  { %v37_v25 = vrot.slane %v36_v21, 1  ;;  %v43_v26 = vadd.f32 %v42_v22, %v41_v15  ;;  %v51_v27 = vrot.slane %v50_v23, 1  ;;  %v57_v28 = vadd.f32 %v56_v24, %v55_v17 }
  0x1f   :  { %v38_v31 = vadd.f32 %v37_v25, %v36_v21  ;;  %v44_v32 = vrot.slane %v43_v26, 1  ;;  %v52_v33 = vadd.f32 %v51_v27, %v50_v23  ;;  %v58_v34 = vrot.slane %v57_v28, 1 }
  0x21   :  { %v45_v35 = vadd.f32 %v44_v32, %v43_v26  ;;  %v59_v36 = vadd.f32 %v58_v34, %v57_v28  ;;  %v60_v37 = vmul.f32 0.25, %v38_v31  ;;  %v62_v38 = vmul.f32 0.25, %v52_v33 }
  0x23   :  { %v61_v39 = vmul.f32 0.25, %v45_v35  ;;  %v63_v40 = vmul.f32 0.25, %v59_v36 }
  0x25   :  { %v68_v42 = vcombine.low %v60_v37, %v61_v39  ;;  %v76_v43 = vcombine.low %v62_v38, %v63_v40 }
  0x27   :  { %v75_v44 = vrot.slane %v68_v42, %v74_v41  ;;  %v83_v45 = vrot.slane %v76_v43, %v74_v41 }
  0x29   :  { %v88_v46 = vrot.slane %v83_v45, 7 }
  0x2b   :  { %v90_v47 = vsel %vm89_vm1, %v88_v46, %v75_v44 }
  0x2c   :  { %v92_v48 = vsel %vm91_vm2, %v88_v46, %v90_v47 }
  0x2d   :  { %v94_v49 = vsel %vm93_vm3, %v88_v46, %v92_v48 }
  0x2e   :  { %v96_v50 = vsel %vm95_vm4, %v88_v46, %v94_v49 }
  0x2f   :  { %98 = vst [vmem:[#allocation5] sm:$0xf] %v96_v50 }
  0x30   :  { %154 = shalt.err (!%p151_p12)
}
  0x31   :  { %s155_s24 = scalar_lea.hbm %s209_s1, 64 }
  0x32   :  { %p156_p13 = scmp.ne.s32.totalorder %s209_s1, %s155_s24  ;;  %p159_p0 = scmp.lt.u32.totalorder %s155_s24, %s209_s1 }
  0x34   :  { %p161_p1 = pnand %p159_p0, %p156_p13 }
  0x36   :  { %164 = shalt.err (!%p161_p1)
}
  0x37   :  { %108 = dma.vmem_to_hbm [thread:$0]  %s106_s20, 64, %s209_s1, [#allocation4]  }
  0x38   :  { %167 = dma.done.wait [#allocation4], 64  }
  0x39   :  { %168 = vsyncadd [#allocation4], 4294967232 }
  0x3a   :  { %112 = vsyncpa [#allocation3], 1 }
  0x3b   :  { %113 = vsyncpa [#allocation4], 1 }

</bundles_post_ra>
